<compile_context>
chip_gen: v7x
topology: tpu7x:2x2x1
jax: 0.10.0
libtpu: 0.0.40
codegen_flags: <defaults>
</compile_context>

<pallas_src>
import jax
import jax.numpy as jnp
from jax.experimental import pallas as pl
from jax.experimental.pallas import tpu as pltpu


_POOLED = 49    # 7*7 pooled pixels (sublane axis inside the kernel)
_WIN = 9        # 3*3 pooling-window elements (leading, unrolled axis)
_HID = 16       # hidden width of f1
_LANE = 128     # lane width: batch is padded / tiled in multiples of this
_MAX_BT = 2048  # max batch columns (lanes) per grid step


def _round_up(n, m):
    return (n + m - 1) // m * m


def net_kernel(xw_ref, w1_ref, b1_ref, w2_ref, b2_ref, out_ref):
    """One batch tile, batch on the lane axis.

    xw_ref : (9, 49, Bt)  window elements leading, pooled pixels on sublanes,
                          batch on lanes
    w1_ref : (16, 49)     f1.weight (native PyTorch layout)
    b1_ref : (16, 1)      f1.bias
    w2_ref : (A8, 16)     f2.weight, rows zero-padded to a multiple of 8
    b2_ref : (A8, 1)      f2.bias, zero-padded
    out_ref: (A8, Bt)     lane-dense output tile (sliced/transposed outside)
    """
    # MaxPool2d(3) + flatten: 8 unrolled element-wise maxes (pure VPU).
    pooled = xw_ref[0]
    for i in range(1, _WIN):
        pooled = jnp.maximum(pooled, xw_ref[i])                       # (49, Bt)

    # Linear(49, 16) + ReLU, computed as W1 @ pooled (batch stays on lanes).
    h = jnp.dot(w1_ref[...], pooled,
                preferred_element_type=jnp.float32) + b1_ref[...]     # (16, Bt)
    h = jnp.maximum(h, 0.0)
    # Linear(16, A) with rows padded to A8.
    out = jnp.dot(w2_ref[...], h,
                  preferred_element_type=jnp.float32) + b2_ref[...]   # (A8, Bt)
    out_ref[...] = out.astype(out_ref.dtype)


def prepare_params(w1, b1, w2, b2):
    """One-time parameter preprocessing (tiny zero-pad of f2 to 8 rows).

    w1: (16, 49), b1: (16,), w2: (A, 16), b2: (A,)  -- PyTorch layout.
    """
    num_actions = w2.shape[0]
    a_pad = _round_up(num_actions, 8)

    w1 = jnp.asarray(w1, jnp.float32)                      # (16, 49) as-is
    b1c = jnp.asarray(b1, jnp.float32).reshape(_HID, 1)    # (16, 1)

    w2p = jnp.zeros((a_pad, _HID), jnp.float32)
    w2p = w2p.at[:num_actions, :].set(jnp.asarray(w2, jnp.float32))
    b2c = jnp.zeros((a_pad, 1), jnp.float32)
    b2c = b2c.at[:num_actions, 0].set(jnp.asarray(b2, jnp.float32).reshape(-1))

    return {"w1": w1, "b1": b1c, "w2": w2p, "b2": b2c,
            "num_actions": num_actions, "a_pad": a_pad}


def net_forward(x, params):
    """x: (B, 1, 21, 21) NCHW float32; returns (B, num_actions) float32."""
    B, C, H, W = x.shape
    assert C == 1 and H == 21 and W == 21, \
        "shapes must match Linear(49, 16) after MaxPool2d(3)"

    num_actions = params["num_actions"]
    a_pad = params["a_pad"]

    # Batch tiling: batch lives on lanes -> 128 granularity. Take the largest
    # tile up to _MAX_BT, but keep >= 2 grid steps whenever the padded batch
    # allows it so v7x can shard the parallel axis across its 2 TensorCores.
    b_pad = _round_up(B, _LANE)
    bt = min(_MAX_BT, _round_up(b_pad // 2, _LANE))
    bt = min(bt, b_pad)
    b_pad = _round_up(b_pad, bt)

    x = jnp.asarray(x, jnp.float32).reshape(B, H, W)
    if b_pad != B:
        x = jnp.pad(x, ((0, b_pad - B), (0, 0), (0, 0)))

    # Layout glue: non-overlapping 3x3 windows -> (9, 49, B_pad)
    #   axis 0 : window element (dh*3 + dw)  -> unrolled maxes in-kernel
    #   axis 1 : pooled pixel   (h7*7 + w7)  -> sublane axis
    #   axis 2 : batch                       -> lane axis (dense)
    # TODO(synk): for peak large-batch throughput have the producer emit x in
    # this window-major layout directly; this transpose re-reads/writes the
    # whole input once in HBM before the kernel reads it again.
    xw = (x.reshape(b_pad, 7, 3, 7, 3)
            .transpose(2, 4, 1, 3, 0)
            .reshape(_WIN, _POOLED, b_pad))

    grid = (b_pad // bt,)
    flops = b_pad * (2 * _POOLED * _HID + 2 * _HID * a_pad + (_WIN - 1) * _POOLED)
    bytes_accessed = 4 * (xw.size + params["w1"].size + params["b1"].size
                          + params["w2"].size + params["b2"].size + b_pad * a_pad)

    out = pl.pallas_call(
        net_kernel,
        out_shape=jax.ShapeDtypeStruct((a_pad, b_pad), jnp.float32),
        grid_spec=pltpu.PrefetchScalarGridSpec(
            num_scalar_prefetch=0,
            grid=grid,
            in_specs=[
                pl.BlockSpec((_WIN, _POOLED, bt), lambda b: (0, 0, b)),  # windows
                pl.BlockSpec((_HID, _POOLED), lambda b: (0, 0)),         # w1 (VMEM-resident)
                pl.BlockSpec((_HID, 1), lambda b: (0, 0)),               # b1
                pl.BlockSpec((a_pad, _HID), lambda b: (0, 0)),           # w2 (padded rows)
                pl.BlockSpec((a_pad, 1), lambda b: (0, 0)),              # b2 (padded)
            ],
            out_specs=pl.BlockSpec((a_pad, bt), lambda b: (0, b)),
        ),
        compiler_params=pltpu.CompilerParams(
            dimension_semantics=("parallel",),
        ),
        cost_estimate=pl.CostEstimate(
            flops=flops, transcendentals=0, bytes_accessed=bytes_accessed),
    )(xw, params["w1"], params["b1"], params["w2"], params["b2"])

    # (A8, B_pad) -> (B, num_actions); tiny transpose done in the wrapper.
    return out[:num_actions, :B].T


def init_params(key, num_actions):
    """Deterministic parameter init mirroring the PyTorch module's shapes."""
    k1, k2, k3, k4 = jax.random.split(key, 4)
    w1 = 0.1 * jax.random.normal(k1, (16, 49), dtype=jnp.float32)           # f1.weight
    b1 = jax.random.uniform(k2, (16,), minval=-0.1, maxval=0.1,
                            dtype=jnp.float32)                              # f1.bias
    w2 = 0.1 * jax.random.normal(k3, (num_actions, 16), dtype=jnp.float32)  # f2.weight
    b2 = jax.random.uniform(k4, (num_actions,), minval=-0.1, maxval=0.1,
                            dtype=jnp.float32)                              # f2.bias
    return w1, b1, w2, b2


if __name__ == "__main__":
    key = jax.random.PRNGKey(0)
    k_x, k_p = jax.random.split(key)

    B = 2
    num_actions = 8
    x = jax.random.normal(k_x, (B, 1, 21, 21), dtype=jnp.float32)   # NCHW, like PyTorch
    w1, b1, w2, b2 = init_params(k_p, num_actions)

    params = prepare_params(w1, b1, w2, b2)   # one-time padding
    out = net_forward(x, params)
    out = jax.block_until_ready(out)

    # reference check in plain JAX (same math, no Pallas)
    pooled_ref = x.reshape(B, 7, 3, 7, 3).max(axis=(2, 4)).reshape(B, 49)
    h_ref = jnp.maximum(pooled_ref @ w1.T + b1, 0.0)
    ref = h_ref @ w2.T + b2
    assert out.shape == (B, num_actions)
    assert jnp.allclose(out, ref, atol=1e-4, rtol=1e-4), \
        float(jnp.max(jnp.abs(out - ref)))

    print("KERNEL_OK")
</pallas_src>

<mosaic_0001>
module attributes {stable_mosaic.version = 11 : i64} {
  func.func @net_kernel(%arg0: i32, %arg1: memref<9x49x128xf32, #tpu.memory_space<vmem>>, %arg2: memref<16x49xf32, #tpu.memory_space<vmem>>, %arg3: memref<16x1xf32, #tpu.memory_space<vmem>>, %arg4: memref<8x16xf32, #tpu.memory_space<vmem>>, %arg5: memref<8x1xf32, #tpu.memory_space<vmem>>, %arg6: memref<8x128xf32, #tpu.memory_space<vmem>>) attributes {dimension_semantics = [#tpu.dimension_semantics<parallel>], iteration_bounds = array<i64: 1>, scalar_prefetch = 0 : i64, scratch_operands = 0 : i64, tpu.core_type = #tpu.core_type<tc>, window_params = [{transform_indices = @transform_0, window_bounds = array<i64: 9, 49, 128>}, {pipeline_mode = #tpu.pipeline_mode<synchronous>, transform_indices = @transform_1, window_bounds = array<i64: 16, 49>}, {pipeline_mode = #tpu.pipeline_mode<synchronous>, transform_indices = @transform_2, window_bounds = array<i64: 16, 1>}, {pipeline_mode = #tpu.pipeline_mode<synchronous>, transform_indices = @transform_3, window_bounds = array<i64: 8, 16>}, {pipeline_mode = #tpu.pipeline_mode<synchronous>, transform_indices = @transform_4, window_bounds = array<i64: 8, 1>}, {transform_indices = @transform_5, window_bounds = array<i64: 8, 128>}]} {
    %c0 = arith.constant 0 : index
    %c0_0 = arith.constant 0 : index
    %c0_1 = arith.constant 0 : index
    %0 = vector.load %arg1[%c0, %c0_0, %c0_1] : memref<9x49x128xf32, #tpu.memory_space<vmem>>, vector<1x49x128xf32>
    %1 = vector.shape_cast %0 : vector<1x49x128xf32> to vector<49x128xf32>
    %c1 = arith.constant 1 : index
    %c0_2 = arith.constant 0 : index
    %c0_3 = arith.constant 0 : index
    %2 = vector.load %arg1[%c1, %c0_2, %c0_3] : memref<9x49x128xf32, #tpu.memory_space<vmem>>, vector<1x49x128xf32>
    %3 = vector.shape_cast %2 : vector<1x49x128xf32> to vector<49x128xf32>
    %4 = arith.maximumf %1, %3 : vector<49x128xf32>
    %c2 = arith.constant 2 : index
    %c0_4 = arith.constant 0 : index
    %c0_5 = arith.constant 0 : index
    %5 = vector.load %arg1[%c2, %c0_4, %c0_5] : memref<9x49x128xf32, #tpu.memory_space<vmem>>, vector<1x49x128xf32>
    %6 = vector.shape_cast %5 : vector<1x49x128xf32> to vector<49x128xf32>
    %7 = arith.maximumf %4, %6 : vector<49x128xf32>
    %c3 = arith.constant 3 : index
    %c0_6 = arith.constant 0 : index
    %c0_7 = arith.constant 0 : index
    %8 = vector.load %arg1[%c3, %c0_6, %c0_7] : memref<9x49x128xf32, #tpu.memory_space<vmem>>, vector<1x49x128xf32>
    %9 = vector.shape_cast %8 : vector<1x49x128xf32> to vector<49x128xf32>
    %10 = arith.maximumf %7, %9 : vector<49x128xf32>
    %c4 = arith.constant 4 : index
    %c0_8 = arith.constant 0 : index
    %c0_9 = arith.constant 0 : index
    %11 = vector.load %arg1[%c4, %c0_8, %c0_9] : memref<9x49x128xf32, #tpu.memory_space<vmem>>, vector<1x49x128xf32>
    %12 = vector.shape_cast %11 : vector<1x49x128xf32> to vector<49x128xf32>
    %13 = arith.maximumf %10, %12 : vector<49x128xf32>
    %c5 = arith.constant 5 : index
    %c0_10 = arith.constant 0 : index
    %c0_11 = arith.constant 0 : index
    %14 = vector.load %arg1[%c5, %c0_10, %c0_11] : memref<9x49x128xf32, #tpu.memory_space<vmem>>, vector<1x49x128xf32>
    %15 = vector.shape_cast %14 : vector<1x49x128xf32> to vector<49x128xf32>
    %16 = arith.maximumf %13, %15 : vector<49x128xf32>
    %c6 = arith.constant 6 : index
    %c0_12 = arith.constant 0 : index
    %c0_13 = arith.constant 0 : index
    %17 = vector.load %arg1[%c6, %c0_12, %c0_13] : memref<9x49x128xf32, #tpu.memory_space<vmem>>, vector<1x49x128xf32>
    %18 = vector.shape_cast %17 : vector<1x49x128xf32> to vector<49x128xf32>
    %19 = arith.maximumf %16, %18 : vector<49x128xf32>
    %c7 = arith.constant 7 : index
    %c0_14 = arith.constant 0 : index
    %c0_15 = arith.constant 0 : index
    %20 = vector.load %arg1[%c7, %c0_14, %c0_15] : memref<9x49x128xf32, #tpu.memory_space<vmem>>, vector<1x49x128xf32>
    %21 = vector.shape_cast %20 : vector<1x49x128xf32> to vector<49x128xf32>
    %22 = arith.maximumf %19, %21 : vector<49x128xf32>
    %c8 = arith.constant 8 : index
    %c0_16 = arith.constant 0 : index
    %c0_17 = arith.constant 0 : index
    %23 = vector.load %arg1[%c8, %c0_16, %c0_17] : memref<9x49x128xf32, #tpu.memory_space<vmem>>, vector<1x49x128xf32>
    %24 = vector.shape_cast %23 : vector<1x49x128xf32> to vector<49x128xf32>
    %25 = arith.maximumf %22, %24 : vector<49x128xf32>
    %c0_18 = arith.constant 0 : index
    %c0_19 = arith.constant 0 : index
    %26 = vector.load %arg2[%c0_18, %c0_19] : memref<16x49xf32, #tpu.memory_space<vmem>>, vector<16x49xf32>
    %cst = arith.constant dense<0.000000e+00> : vector<16x128xf32>
    %27 = tpu.matmul %26, %25, %cst {dimension_numbers = #tpu.dot_dimension_numbers<[1], [0], [0], [1], [0, 0, 1, 1], [], []>} : vector<16x49xf32>, vector<49x128xf32>, vector<16x128xf32> -> vector<16x128xf32>
    %c0_20 = arith.constant 0 : index
    %c0_21 = arith.constant 0 : index
    %28 = vector.load %arg3[%c0_20, %c0_21] : memref<16x1xf32, #tpu.memory_space<vmem>>, vector<16x1xf32>
    %29 = vector.broadcast %28 : vector<16x1xf32> to vector<16x128xf32>
    %30 = arith.addf %27, %29 : vector<16x128xf32>
    %cst_22 = arith.constant 0.000000e+00 : f32
    %31 = vector.broadcast %cst_22 : f32 to vector<16x128xf32>
    %32 = arith.maximumf %30, %31 : vector<16x128xf32>
    %c0_23 = arith.constant 0 : index
    %c0_24 = arith.constant 0 : index
    %33 = vector.load %arg4[%c0_23, %c0_24] : memref<8x16xf32, #tpu.memory_space<vmem>>, vector<8x16xf32>
    %cst_25 = arith.constant dense<0.000000e+00> : vector<8x128xf32>
    %34 = tpu.matmul %33, %32, %cst_25 {dimension_numbers = #tpu.dot_dimension_numbers<[1], [0], [0], [1], [0, 0, 1, 1], [], []>} : vector<8x16xf32>, vector<16x128xf32>, vector<8x128xf32> -> vector<8x128xf32>
    %c0_26 = arith.constant 0 : index
    %c0_27 = arith.constant 0 : index
    %35 = vector.load %arg5[%c0_26, %c0_27] : memref<8x1xf32, #tpu.memory_space<vmem>>, vector<8x1xf32>
    %36 = vector.broadcast %35 : vector<8x1xf32> to vector<8x128xf32>
    %37 = arith.addf %34, %36 : vector<8x128xf32>
    %c0_28 = arith.constant 0 : index
    %c0_29 = arith.constant 0 : index
    %38 = vector.load %arg6[%c0_28, %c0_29] : memref<8x128xf32, #tpu.memory_space<vmem>>, vector<8x128xf32>
    tpu.vector_store %arg6[%c0_28, %c0_29], %37 {strides = array<i32>} : memref<8x128xf32, #tpu.memory_space<vmem>>, vector<8x128xf32>,
    return
  }
  func.func @transform_0(%arg0: i32) -> (i32, i32, i32) {
    %c0_i32 = arith.constant 0 : i32
    %c0_i32_0 = arith.constant 0 : i32
    %c0_i32_1 = arith.constant 0 : i32
    return %c0_i32, %c0_i32_0, %arg0 : i32, i32, i32
  }
  func.func @transform_1(%arg0: i32) -> (i32, i32) {
    %c0_i32 = arith.constant 0 : i32
    %c0_i32_0 = arith.constant 0 : i32
    %c0_i32_1 = arith.constant 0 : i32
    return %c0_i32, %c0_i32_0 : i32, i32
  }
  func.func @transform_2(%arg0: i32) -> (i32, i32) {
    %c0_i32 = arith.constant 0 : i32
    %c0_i32_0 = arith.constant 0 : i32
    %c0_i32_1 = arith.constant 0 : i32
    return %c0_i32, %c0_i32_0 : i32, i32
  }
  func.func @transform_3(%arg0: i32) -> (i32, i32) {
    %c0_i32 = arith.constant 0 : i32
    %c0_i32_0 = arith.constant 0 : i32
    %c0_i32_1 = arith.constant 0 : i32
    return %c0_i32, %c0_i32_0 : i32, i32
  }
  func.func @transform_4(%arg0: i32) -> (i32, i32) {
    %c0_i32 = arith.constant 0 : i32
    %c0_i32_0 = arith.constant 0 : i32
    %c0_i32_1 = arith.constant 0 : i32
    return %c0_i32, %c0_i32_0 : i32, i32
  }
  func.func @transform_5(%arg0: i32) -> (i32, i32) {
    %c0_i32 = arith.constant 0 : i32
    %c0_i32_0 = arith.constant 0 : i32
    return %c0_i32, %arg0 : i32, i32
  }
}

</mosaic_0001>

<bundles_post_ra>
// kernel: tpu_custom_call.1
= control target key start
LH: loop header
LB: loop body
LE: loop exit
PB: predicated region body
PF: predicated region fallthrough
CT: control target
= control target key end

     0   :  { %10 = vsyncpa [#allocation3], 0  ;;  %s556_s0 = inlined_call_operand.hbm [shape: f32[9,49,128], index: 0, kind: input, shape index: {}]   ;;  %s557_s1 = inlined_call_operand.vmem [shape: f32[16,49], index: 1, kind: input, shape index: {}]   ;;  %s558_s2 = inlined_call_operand.vmem [shape: f32[16,1], index: 2, kind: input, shape index: {}]   ;;  %s559_s3 = inlined_call_operand.vmem [shape: f32[8,16], index: 3, kind: input, shape index: {}]   ;;  %s560_s4 = inlined_call_operand.vmem [shape: f32[8,1], index: 4, kind: input, shape index: {}]   ;;  %s561_s5 = inlined_call_operand.hbm [shape: f32[8,128], index: 5, kind: output, shape index: {}]  }
   0x1   :  { %11 = vsyncpa [#allocation4], 0  ;;  %s474_s18 = smov [#allocation2]   ;;  %s426_s22 = scalar_lea.hbm %s556_s0, 8064 }
   0x2   :  { %s17_s19 = sshll.u32 %s474_s18, 4  ;;  %p427_p0 = scmp.ne.s32.totalorder %s556_s0, %s426_s22  ;;  %s18_s19 = int_to_ptr.vmem [resolvable:$true] %s17_s19 }
   0x3   :  { %p430_p1 = scmp.lt.u32.totalorder %s426_s22, %s556_s0 }
   0x5   :  { %p432_p2 = pnand %p430_p1, %p427_p0 }
   0x7   :  { %435 = shalt.err (!%p432_p2)
}
   0x8   :  { %s436_s27 = scalar_lea.vmem %s18_s19, 8064  ;;  %p441_p4 = scmp.lt.s32.totalorder %s18_s19, %s18_s19 }
   0x9   :  { %p437_p3 = scmp.ne.s32.totalorder %s18_s19, %s436_s27  ;;  %p442_p5 = scmp.lt.s32.totalorder %s436_s27, %s436_s27 }
   0xb   :  { %p443_p6 = por %p442_p5, %p441_p4 }
   0xd   :  { %p444_p7 = pnand %p443_p6, %p437_p3 }
   0xf   :  { %447 = shalt.err (!%p444_p7)
}
  0x10   :  { %s475_s28 = smov 128   ;;  %s476_s29 = smov 8  }
  0x11   :  { %23 = dma.hbm_to_vmem [thread:$0]  %s556_s0, 8064, %s18_s19, [#allocation3], %s475_s28, %s475_s28, %s476_s29  }
  0x12   :  { %470 = dma.done.wait [#allocation3], 8064  }
  0x13   :  { %471 = vsyncadd [#allocation3], 4294959232  ;;  %v477_v0 = vmov 0   ;;  %v35_v1 = vld [vmem:[#allocation2] sm:$0xff]  ;;  %v36_v2 = vld [vmem:[#allocation2 + $0x8] sm:$0xff]  ;;  %vm176_vm0 = vcmask 400384  }
  0x14   :  { %424 = vset.pattern.permute.xlu0 %v477_v0  ;;  %425 = vset.pattern.permute.xlu1 %v477_v0  ;;  %v43_v3 = vld [vmem:[#allocation2 + $0x38] sm:$0xff]  ;;  %v44_v4 = vld [vmem:[#allocation2 + $0x40] sm:$0xff]  ;;  %v58_v6 = vld [vmem:[#allocation2 + $0x70] sm:$0xff]  ;;  %vm183_vm1 = vcmask 1040384   ;;  %vm479_vm2 = vmmov 0   ;;  %vm271_vm3 = vcmask 130048  }
  0x15   :  { %v50_v5 = vmax.f32 %v35_v1, %v43_v3  ;;  %v59_v7 = vld [vmem:[#allocation2 + $0x78] sm:$0xff]  ;;  %v51_v8 = vmax.f32 %v36_v2, %v44_v4  ;;  %v73_v9 = vld [vmem:[#allocation2 + $0xa8] sm:$0xff]  ;;  %v74_v11 = vld [vmem:[#allocation2 + $0xb0] sm:$0xff]  ;;  %s481_s16 = smov [#allocation5]  }
  0x16   :  { %v88_v13 = vld [vmem:[#allocation2 + $0xe0] sm:$0xff]  ;;  %v89_v15 = vld [vmem:[#allocation2 + $0xe8] sm:$0xff]  ;;  %v103_v16 = vld [vmem:[#allocation2 + $0x118] sm:$0xff] }
  0x17   :  { %v65_v10 = vmax.f32 %v50_v5, %v58_v6  ;;  %v66_v12 = vmax.f32 %v51_v8, %v59_v7  ;;  %v104_v17 = vld [vmem:[#allocation2 + $0x120] sm:$0xff]  ;;  %v37_v19 = vld [vmem:[#allocation2 + $0x10] sm:$0xff]  ;;  %v38_v20 = vld [vmem:[#allocation2 + $0x18] sm:$0xff] }
  0x18   :  { %v45_v21 = vld [vmem:[#allocation2 + $0x48] sm:$0xff]  ;;  %v46_v23 = vld [vmem:[#allocation2 + $0x50] sm:$0xff]  ;;  %v60_v25 = vld [vmem:[#allocation2 + $0x80] sm:$0xff] }
  0x19   :  { %v80_v14 = vmax.f32 %v65_v10, %v73_v9  ;;  %v81_v18 = vmax.f32 %v66_v12, %v74_v11  ;;  %v52_v24 = vmax.f32 %v37_v19, %v45_v21  ;;  %v61_v26 = vld [vmem:[#allocation2 + $0x88] sm:$0xff]  ;;  %v118_v28 = vld [vmem:[#allocation2 + $0x150] sm:$0xff]  ;;  %v53_v29 = vmax.f32 %v38_v20, %v46_v23  ;;  %v75_v30 = vld [vmem:[#allocation2 + $0xb8] sm:$0xff] }
  0x1a   :  { %v119_v32 = vld [vmem:[#allocation2 + $0x158] sm:$0xff]  ;;  %v133_v33 = vld [vmem:[#allocation2 + $0x188] sm:$0xff]  ;;  %v76_v35 = vld [vmem:[#allocation2 + $0xc0] sm:$0xff] }
  0x1b   :  { %v95_v22 = vmax.f32 %v80_v14, %v88_v13  ;;  %v96_v27 = vmax.f32 %v81_v18, %v89_v15  ;;  %v67_v34 = vmax.f32 %v52_v24, %v60_v25  ;;  %v134_v37 = vld [vmem:[#allocation2 + $0x190] sm:$0xff]  ;;  %v148_v38 = vld [vmem:[#allocation2 + $0x1c0] sm:$0xff]  ;;  %v68_v39 = vmax.f32 %v53_v29, %v61_v26  ;;  %v149_v42 = vld [vmem:[#allocation2 + $0x1c8] sm:$0xff] }
  0x1c   :  { %v90_v40 = vld [vmem:[#allocation2 + $0xf0] sm:$0xff]  ;;  %v91_v44 = vld [vmem:[#allocation2 + $0xf8] sm:$0xff]  ;;  %v105_v45 = vld [vmem:[#allocation2 + $0x128] sm:$0xff] }
  0x1d   :  { %v110_v31 = vmax.f32 %v95_v22, %v103_v16  ;;  %v111_v36 = vmax.f32 %v96_v27, %v104_v17  ;;  %v82_v43 = vmax.f32 %v67_v34, %v75_v30  ;;  %v106_v46 = vld [vmem:[#allocation2 + $0x130] sm:$0xff]  ;;  %v83_v48 = vmax.f32 %v68_v39, %v76_v35  ;;  %v39_v49 = vld [vmem:[#allocation2 + $0x20] sm:$0xff]  ;;  %v40_v50 = vld [vmem:[#allocation2 + $0x28] sm:$0xff] }
  0x1e   :  { %v47_v51 = vld [vmem:[#allocation2 + $0x58] sm:$0xff]  ;;  %v48_v54 = vld [vmem:[#allocation2 + $0x60] sm:$0xff]  ;;  %v62_v56 = vld [vmem:[#allocation2 + $0x90] sm:$0xff] }
  0x1f   :  { %v125_v41 = vmax.f32 %v110_v31, %v118_v28  ;;  %v126_v47 = vmax.f32 %v111_v36, %v119_v32  ;;  %v97_v53 = vmax.f32 %v82_v43, %v90_v40  ;;  %v54_v55 = vmax.f32 %v39_v49, %v47_v51  ;;  %v63_v57 = vld [vmem:[#allocation2 + $0x98] sm:$0xff]  ;;  %v120_v60 = vld [vmem:[#allocation2 + $0x160] sm:$0xff]  ;;  %v77_v62 = vld [vmem:[#allocation2 + $0xc8] sm:$0xff] }
  0x20   :  { %v98_v59 = vmax.f32 %v83_v48, %v91_v44  ;;  %v55_v61 = vmax.f32 %v40_v50, %v48_v54  ;;  %v121_v1 = vld [vmem:[#allocation2 + $0x168] sm:$0xff]  ;;  %v78_v3 = vld [vmem:[#allocation2 + $0xd0] sm:$0xff]  ;;  %v135_v6 = vld [vmem:[#allocation2 + $0x198] sm:$0xff] }
  0x21   :  { %v140_v52 = vmax.f32 %v125_v41, %v133_v33  ;;  %v141_v58 = vmax.f32 %v126_v47, %v134_v37  ;;  %v112_v0 = vmax.f32 %v97_v53, %v105_v45  ;;  %v69_v2 = vmax.f32 %v54_v55, %v62_v56  ;;  %v136_v7 = vld [vmem:[#allocation2 + $0x1a0] sm:$0xff]  ;;  %v150_v11 = vld [vmem:[#allocation2 + $0x1d0] sm:$0xff]  ;;  %v93_v13 = vld [vmem:[#allocation2 + $0x108] sm:$0xff] }
  0x22   :  { %v113_v5 = vmax.f32 %v98_v59, %v106_v46  ;;  %v70_v8 = vmax.f32 %v55_v61, %v63_v57  ;;  %v92_v9 = vld [vmem:[#allocation2 + $0x100] sm:$0xff]  ;;  %v107_v14 = vld [vmem:[#allocation2 + $0x138] sm:$0xff]  ;;  %v41_v18 = vld [vmem:[#allocation2 + $0x30] sm:$0x1] }
  0x23   :  { %v155_v63 = vmax.f32 %v140_v52, %v148_v38  ;;  %v156_v4 = vmax.f32 %v141_v58, %v149_v42  ;;  %v127_v10 = vmax.f32 %v112_v0, %v120_v60  ;;  %v84_v12 = vmax.f32 %v69_v2, %v77_v62  ;;  %v49_v19 = vld [vmem:[#allocation2 + $0x68] sm:$0x1]  ;;  %v64_v20 = vld [vmem:[#allocation2 + $0xa0] sm:$0x1]  ;;  %v151_v22 = vld [vmem:[#allocation2 + $0x1d8] sm:$0xff] }
  0x24   :  { %v128_v16 = vmax.f32 %v113_v5, %v121_v1  ;;  %v85_v17 = vmax.f32 %v70_v8, %v78_v3  ;;  %v108_v24 = vld [vmem:[#allocation2 + $0x140] sm:$0xff]  ;;  %v56_v25 = vmax.f32 %v41_v18, %v49_v19  ;;  %v122_v28 = vld [vmem:[#allocation2 + $0x170] sm:$0xff]  ;;  %v79_v29 = vld [vmem:[#allocation2 + $0xd8] sm:$0x1]  ;;  %v480_v0 = vmov 0.0  }
  0x25   :  { %v401_v15 = vpack.c.bf16 %v156_v4, %v155_v63  ;;  %v142_v21 = vmax.f32 %v127_v10, %v135_v6  ;;  %v99_v23 = vmax.f32 %v84_v12, %v92_v9  ;;  %v123_v32 = vld [vmem:[#allocation2 + $0x178] sm:$0xff]  ;;  %v162_v34 = vld [vmem:[%s557_s1] sm:$0xff]  ;;  %v137_v38 = vld [vmem:[#allocation2 + $0x1a8] sm:$0xff]  ;;  %v478_v63 = vmov 0.0|0.0   ;;  %398 = vmatprep.mubr.msk.f32.mxu1 %vm479_vm2, %v480_v0 }
  0x26   :  { %v143_v26 = vmax.f32 %v128_v16, %v136_v7  ;;  %v100_v27 = vmax.f32 %v85_v17, %v93_v13  ;;  %v71_v33 = vmax.f32 %v56_v25, %v64_v20  ;;  %v164_v35 = vld [vmem:[%s558_s2] sm:$0xff]  ;;  %v94_v39 = vld [vmem:[#allocation2 + $0x110] sm:$0x1]  ;;  %391 = vmatprep.mubr.msk.f32.mxu0 %vm176_vm0, %v162_v34  ;;  %v165_v43 = vld [vmem:[%s558_s2 + $0x8] sm:$0xff]  ;;  %413 = vmatprep.subr.bf16.mxu1 %v478_v63 }
  0x27   :  { %402 = vmatprep.subr.bf16.mxu0 %v401_v15  ;;  %v157_v30 = vmax.f32 %v142_v21, %v150_v11  ;;  %v114_v31 = vmax.f32 %v99_v23, %v107_v14  ;;  %168 = vperm.xlu0 %424, %v164_v35   ;;  %v138_v41 = vld [vmem:[#allocation2 + $0x1b0] sm:$0xff]  ;;  %v152_v46 = vld [vmem:[#allocation2 + $0x1e0] sm:$0xff]  ;;  %v109_v47 = vld [vmem:[#allocation2 + $0x148] sm:$0x1] }
  0x28   :  { %404 = vmatpush3.bf16.msra.mxu0 %v401_v15  ;;  %v158_v36 = vmax.f32 %v143_v26, %v151_v22  ;;  %v115_v37 = vmax.f32 %v100_v27, %v108_v24  ;;  %v86_v42 = vmax.f32 %v71_v33, %v79_v29  ;;  %v153_v49 = vld [vmem:[#allocation2 + $0x1e8] sm:$0xff]  ;;  %v124_v52 = vld [vmem:[#allocation2 + $0x180] sm:$0x1]  ;;  %v139_v56 = vld [vmem:[#allocation2 + $0x1b8] sm:$0x1] }
  0x29   :  { %v129_v40 = vmax.f32 %v114_v31, %v122_v28  ;;  %v154_v59 = vld [vmem:[#allocation2 + $0x1f0] sm:$0x1]  ;;  %v163_v62 = vld [vmem:[%s557_s1 + $0x8] sm:$0xff]  ;;  %v265_v1 = vld [vmem:[%s560_s4] sm:$0xff]  ;;  %s352_s4 = sshll.u32 %s481_s16, 4  ;;  %s353_s4 = int_to_ptr.vmem [resolvable:$true] %s352_s4 }
  0x2a   :  { %v405_v44 = vpack.c.bf16 %v158_v36, %v157_v30  ;;  %v130_v45 = vmax.f32 %v115_v37, %v123_v32  ;;  %v101_v50 = vmax.f32 %v86_v42, %v94_v39  ;;  %268 = vperm.xlu1 %425, %v265_v1   ;;  %v264_v11 = vld [vmem:[%s559_s3] sm:$0xff]  ;;  %s448_s17 = scalar_lea.vmem %s353_s4, 128  ;;  %p453_p9 = scmp.lt.s32.totalorder %s353_s4, %s353_s4 }
  0x2b   :  { %v144_v48 = vmax.f32 %v129_v40, %v137_v38  ;;  %173 = vperm.xlu0 %424, %v165_v43   ;;  %p449_p8 = scmp.ne.s32.totalorder %s353_s4, %s448_s17  ;;  %p454_p10 = scmp.lt.s32.totalorder %s448_s17, %s448_s17 }
  0x2c   :  { %406 = vmatprep.subr.bf16.mxu0 %v405_v44  ;;  %v145_v51 = vmax.f32 %v130_v45, %v138_v41  ;;  %v116_v54 = vmax.f32 %v101_v50, %v109_v47 }
  0x2d   :  { %408 = vmatpush3.bf16.msra.mxu0 %v405_v44  ;;  %v159_v53 = vmax.f32 %v144_v48, %v152_v46  ;;  %p455_p11 = por %p454_p10, %p453_p9 }
  0x2e   :  { %v160_v55 = vmax.f32 %v145_v51, %v153_v49  ;;  %v131_v57 = vmax.f32 %v116_v54, %v124_v52 }
  0x2f   :  { %p456_p12 = pnand %p455_p11, %p449_p8 }
  0x30   :  { %v409_v58 = vpack.c.bf16 %v160_v55, %v159_v53  ;;  %v146_v60 = vmax.f32 %v131_v57, %v139_v56 }
  0x32   :  { %410 = vmatprep.subr.bf16.mxu0 %v409_v58  ;;  %v161_v61 = vmax.f32 %v146_v60, %v154_v59 }
  0x33   :  { %412 = vmatpush3.bf16.msra.mxu0 %v409_v58 }
  0x34   :  { %389 = vmatprep.subr.msk.mxu0 %vm183_vm1, %v161_v61 }
  0x37   :  { %390 = vmatpush3.msk.msra.mxu0 %vm183_vm1, %v161_v61 }
  0x38   :  { %392 = vmatmul.mubr.msk.f32.vlgmr.msra.gmra.mrb[0].mxu0 %vm176_vm0, %v163_v62 }
  0xa6   :  { %v169_v2 = vpop.permute.xlu0 %168 }
  0xa9   :  { %v269_v12 = vpop.permute.xlu1 %268 }
  0xaa   :  { %v174_v3 = vpop.permute.xlu0 %173 }
 0x10b   :  { %v393_v4 = vpop.f32.mrb[0].mxu0 }
 0x10c   :  { %v259_v5 = vadd.f32 %v393_v4, %v174_v3  ;;  %v253_v6 = vpop.f32.mrb[1].mxu0 }
 0x10d   :  { %v254_v7 = vadd.f32 %v253_v6, %v169_v2 }
 0x10e   :  { %v263_v8 = vmax.f32 %v259_v5, 0.0 }
 0x10f   :  { %v262_v9 = vmax.f32 %v254_v7, 0.0 }
 0x111   :  { %v414_v10 = vpack.c.bf16 %v263_v8, %v262_v9 }
 0x113   :  { %415 = vmatpush3.bf16.msra.mxu1 %v414_v10 }
 0x116   :  { %399 = vmatmul.mubr.msk.f32.vlgmr.msra.gmra.mrb[0].mxu1 %vm271_vm3, %v264_v11 }
 0x1e9   :  { %v341_v13 = vpop.f32.mrb[0].mxu1 }
 0x1ea   :  { %v342_v14 = vadd.f32 %v341_v13, %v269_v12  ;;  %v400_v15 = vpop.f32.mrb[1].mxu1 }
 0x1ec   :  { %345 = vst [vmem:[#allocation5] sm:$0xff] %v342_v14 }
 0x1ed   :  { %459 = shalt.err (!%p456_p12)
}
 0x1ee   :  { %s460_s3 = scalar_lea.hbm %s561_s5, 128 }
 0x1ef   :  { %p461_p13 = scmp.ne.s32.totalorder %s561_s5, %s460_s3  ;;  %p464_p0 = scmp.lt.u32.totalorder %s460_s3, %s561_s5 }
 0x1f1   :  { %p466_p1 = pnand %p464_p0, %p461_p13 }
 0x1f3   :  { %469 = shalt.err (!%p466_p1)
}
 0x1f4   :  { %355 = dma.vmem_to_hbm [thread:$0]  %s353_s4, 128, %s561_s5, [#allocation4]  }
 0x1f5   :  { %472 = dma.done.wait [#allocation4], 128  }
 0x1f6   :  { %473 = vsyncadd [#allocation4], 4294967168 }
 0x1f7   :  { %359 = vsyncpa [#allocation3], 1 }
 0x1f8   :  { %360 = vsyncpa [#allocation4], 1 }

</bundles_post_ra>
